<compile_context>
chip_gen: v5e
topology: v5e:2x2
jax: 0.10.0
libtpu: 0.0.40
codegen_flags: <defaults>
</compile_context>

<pallas_src>
import functools
import math

import jax
import jax.numpy as jnp
from jax.experimental import pallas as pl
from jax.experimental.pallas import tpu as pltpu


# ----------------------------------------------------------------------------- #
# Pallas kernel
# ----------------------------------------------------------------------------- #
def _gmm_kernel(x_ref, ct_ref, cn_ref, nib_ref, coef_ref, psi_ref, o_ref,
                acc_ref, *, tn, n_valid, need_mask):
    """One (batch-tile, N-tile) grid step.

    x_ref:    (bt, D, tn)   positions (N on lanes), caller dtype (bf16 ok)
    ct_ref:   (bt, K, D)    centers, transposed so D is the contraction axis
    cn_ref:   (bt, K, 1)    |c_k|^2          (precomputed, f32)
    nib_ref:  (bt, K, 1)    -1 / (2*beta)    (precomputed, f32)
    coef_ref: (bt, K, 1)    1 / sqrt(2*pi*beta)
    psi_ref:  (bt, K, tn)   mixture logits
    o_ref:    (bt, K, 1)    output block (written once, at the last N tile)
    acc_ref:  (bt, K, 128)  lane-resident partial-sum accumulator (scratch)
    """
    j = pl.program_id(1)

    @pl.when(j == 0)
    def _():
        acc_ref[...] = jnp.zeros_like(acc_ref)

    x = x_ref[...]                                   # (bt, D, tn)
    ct = ct_ref[...].astype(x.dtype)                 # (bt, K, D)
    psi = psi_ref[...].astype(jnp.float32)           # (bt, K, tn)  f32 math

    # dist = |c|^2 - 2 c.x + |x|^2 ; cross term on the MXU, f32 accumulation.
    cross = jnp.einsum("bkd,bdn->bkn", ct, x,
                       preferred_element_type=jnp.float32)        # (bt,K,tn)
    xf = x.astype(jnp.float32)
    xnorm = jnp.sum(xf * xf, axis=1, keepdims=True)               # (bt,1,tn)
    dist = jnp.maximum(cn_ref[...] - 2.0 * cross + xnorm, 0.0)    # (bt,K,tn)

    # softmax over the K components (per position); denominator reciprocal on
    # the (otherwise idle) EUP.
    m = jnp.max(psi, axis=1, keepdims=True)                       # (bt,1,tn)
    e = jnp.exp(psi - m)                                          # (bt,K,tn)
    inv_denom = pl.reciprocal(jnp.sum(e, axis=1, keepdims=True), approx=True)

    # Gaussian weighting:  exp(-theta) == exp(dist * (-1/(2*beta))).
    g = (e * inv_denom) * jnp.exp(dist * nib_ref[...])            # (bt,K,tn)

    if need_mask:
        # Zero contributions from padded (column >= n_valid) positions.
        col = j * tn + jax.lax.broadcasted_iota(jnp.int32, (1, tn), 1)
        g = jnp.where((col < n_valid)[None], g, 0.0)

    # Deferred cross-lane reduce: accumulate 128-lane-wide partials with plain
    # VPU adds (static, tile-aligned lane slices -> no relayout), one scratch
    # read-modify-write per grid step.
    part = g[:, :, 0:128]
    for s in range(1, tn // 128):
        part = part + g[:, :, s * 128:(s + 1) * 128]
    acc_ref[...] += part

    @pl.when(j == pl.num_programs(1) - 1)
    def _():
        total = jnp.sum(acc_ref[...], axis=2, keepdims=True)      # (bt,K,1)
        o_ref[...] = total * coef_ref[...]


# ----------------------------------------------------------------------------- #
# Wrapper
# ----------------------------------------------------------------------------- #
def gmm_forward(x, centers, betas, psi, *, tn=None, bt=None):
    """Pallas forward of GMM.forward.

    x: (B, D, 1, N), centers: (B, D, K, 1), betas: (B, K, 1), psi: (B, K, N)
    returns attn: (B, K), float32.
    """
    B, D, _, N = x.shape
    K = centers.shape[2]
    assert centers.shape == (B, D, K, 1), centers.shape
    assert betas.shape == (B, K, 1), betas.shape
    assert psi.shape == (B, K, N), psi.shape

    # ---- batch-tile (bt) selection: keep >= 2 steps on the batch grid axis
    # so v7x megacore still engages.
    if bt is None:
        bt = 1
        for cand in (8, 4, 2):
            if B % cand == 0 and B // cand >= 2:
                bt = cand
                break
    assert B % bt == 0, (B, bt)

    # ---- N tiling: pad N to a multiple of 128, big tiles (tn = N_pad <= 8K).
    n_pad = ((N + 127) // 128) * 128
    if tn is None:
        if n_pad <= 8192:
            tn = n_pad
        else:
            tn = 2048
            while n_pad % tn:
                tn //= 2
    assert tn % 128 == 0 and n_pad % tn == 0, (tn, n_pad)
    need_mask = (n_pad != N)

    # ---- operand prep; x / psi keep caller dtype (bf16 halves HBM traffic).
    x3 = x.reshape(B, D, N)
    p3 = psi
    if need_mask:
        x3 = jnp.pad(x3, ((0, 0), (0, 0), (0, n_pad - N)))
        p3 = jnp.pad(p3, ((0, 0), (0, 0), (0, n_pad - N)))

    ct3 = jnp.transpose(centers.reshape(B, D, K), (0, 2, 1)).astype(jnp.float32)
    b3 = betas.astype(jnp.float32)
    cnorm = jnp.sum(ct3 * ct3, axis=2, keepdims=True)             # (B,K,1)
    nib = -0.5 / b3                                               # -1/(2*beta)
    coef = jax.lax.rsqrt(2.0 * math.pi * b3)                      # 1/sqrt(2*pi*b)

    grid = (B // bt, n_pad // tn)

    # Explicit VMEM budget (double-buffered tiles + scratch, with headroom);
    # safe on v5e (16 MiB scoped default) and v7x (64 MiB physical).
    bytes_per_step = (bt * D * tn * x3.dtype.itemsize
                      + bt * K * tn * p3.dtype.itemsize
                      + bt * K * D * 4 + 5 * bt * K * 4 + bt * K * 128 * 4)
    vmem_limit = int(min(48 << 20, max(16 << 20, 6 * bytes_per_step)))

    kernel = functools.partial(_gmm_kernel, tn=tn, n_valid=N,
                               need_mask=need_mask)

    out = pl.pallas_call(
        kernel,
        out_shape=jax.ShapeDtypeStruct((B, K, 1), jnp.float32),
        grid_spec=pltpu.PrefetchScalarGridSpec(
            num_scalar_prefetch=0,
            grid=grid,
            in_specs=[
                pl.BlockSpec((bt, D, tn), lambda b, j: (b, 0, j)),   # x
                pl.BlockSpec((bt, K, D), lambda b, j: (b, 0, 0)),    # centers^T
                pl.BlockSpec((bt, K, 1), lambda b, j: (b, 0, 0)),    # |c|^2
                pl.BlockSpec((bt, K, 1), lambda b, j: (b, 0, 0)),    # -1/(2b)
                pl.BlockSpec((bt, K, 1), lambda b, j: (b, 0, 0)),    # coef
                pl.BlockSpec((bt, K, tn), lambda b, j: (b, 0, j)),   # psi
            ],
            out_specs=pl.BlockSpec((bt, K, 1), lambda b, j: (b, 0, 0)),
            scratch_shapes=[pltpu.VMEM((bt, K, 128), jnp.float32)],
        ),
        compiler_params=pltpu.CompilerParams(
            dimension_semantics=("parallel", "arbitrary"),
            vmem_limit_bytes=vmem_limit),
    )(x3, ct3, cnorm, nib, coef, p3)
    return out.reshape(B, K)


# ----------------------------------------------------------------------------- #
# Pure-JAX reference (direct transcription of the PyTorch forward)
# ----------------------------------------------------------------------------- #
def gmm_reference(x, centers, betas, psi):
    x = x.astype(jnp.float32)
    psi = psi.astype(jnp.float32)
    dist = jnp.sum(jnp.square(centers - x), axis=1)                     # (B,K,N)
    theta = dist / (2.0 * betas)                                        # (B,K,N)
    w = jax.nn.softmax(psi, axis=1)                                     # over K
    attn = jnp.sum(w / jnp.sqrt(2.0 * math.pi * betas) * jnp.exp(-theta),
                   axis=2)                                              # (B,K)
    return attn


# ----------------------------------------------------------------------------- #
if __name__ == "__main__":
    def make_inputs(key, B, D, K, N):
        kx, kc, kb, kp = jax.random.split(key, 4)
        # Small-scale features so the Gaussian terms are O(1).
        x = 0.1 * jax.random.normal(kx, (B, D, 1, N), dtype=jnp.float32)
        centers = 0.1 * jax.random.normal(kc, (B, D, K, 1), dtype=jnp.float32)
        betas = jax.random.uniform(kb, (B, K, 1), minval=0.5, maxval=2.0,
                                   dtype=jnp.float32)
        psi = jax.random.normal(kp, (B, K, N), dtype=jnp.float32)
        return x, centers, betas, psi

    fwd = jax.jit(gmm_forward)

    # 1) f32 inputs, N a multiple of 128 (main case; single full-N tile).
    #    Tolerance 5e-3 rel. accounts for the EUP approximate reciprocal in the
    #    softmax normalization.
    B, D, K, N = 2, 32, 16, 1024
    x, c, b, p = make_inputs(jax.random.PRNGKey(0), B, D, K, N)
    out = jax.block_until_ready(fwd(x, c, b, p))
    ref = gmm_reference(x, c, b, p)
    assert out.shape == (B, K), out.shape
    assert bool(jnp.all(jnp.isfinite(out))), "non-finite output"
    assert bool(jnp.allclose(out, ref, rtol=5e-3, atol=1e-3)), (
        f"f32 mismatch: max abs err {float(jnp.max(jnp.abs(out - ref)))}")

    # 2) bf16 streaming inputs (x, psi) — halves HBM traffic; math stays f32
    #    in-kernel. Compared against the reference evaluated on the same
    #    bf16-rounded inputs.
    xb, pb = x.astype(jnp.bfloat16), p.astype(jnp.bfloat16)
    out_bf = jax.block_until_ready(fwd(xb, c, b, pb))
    ref_bf = gmm_reference(xb, c, b, pb)
    assert bool(jnp.allclose(out_bf, ref_bf, rtol=1e-2, atol=1e-2)), (
        f"bf16 mismatch: max abs err {float(jnp.max(jnp.abs(out_bf - ref_bf)))}")

    # 3) Ragged N (pad + in-kernel masking) and batch tiling (bt > 1).
    B, D, K, N = 8, 16, 8, 200
    x, c, b, p = make_inputs(jax.random.PRNGKey(1), B, D, K, N)
    out = jax.block_until_ready(fwd(x, c, b, p))
    ref = gmm_reference(x, c, b, p)
    assert out.shape == (B, K), out.shape
    assert bool(jnp.allclose(out, ref, rtol=5e-3, atol=1e-3)), (
        f"ragged-N mismatch: max abs err {float(jnp.max(jnp.abs(out - ref)))}")

    print("KERNEL_OK")
</pallas_src>

<mosaic_0001>
module attributes {stable_mosaic.version = 11 : i64} {
  func.func @_gmm_kernel(%arg0: i32, %arg1: i32, %arg2: memref<1x32x1024xf32, #tpu.memory_space<vmem>>, %arg3: memref<1x16x32xf32, #tpu.memory_space<vmem>>, %arg4: memref<1x16x1xf32, #tpu.memory_space<vmem>>, %arg5: memref<1x16x1xf32, #tpu.memory_space<vmem>>, %arg6: memref<1x16x1xf32, #tpu.memory_space<vmem>>, %arg7: memref<1x16x1024xf32, #tpu.memory_space<vmem>>, %arg8: memref<1x16x1xf32, #tpu.memory_space<vmem>>, %arg9: memref<1x16x128xf32, #tpu.memory_space<vmem>>) attributes {dimension_semantics = [#tpu.dimension_semantics<parallel>, #tpu.dimension_semantics<arbitrary>], iteration_bounds = array<i64: 2, 1>, scalar_prefetch = 0 : i64, scratch_operands = 1 : i64, tpu.core_type = #tpu.core_type<tc>, window_params = [{transform_indices = @transform_0, window_bounds = array<i64: 1, 32, 1024>}, {transform_indices = @transform_1, window_bounds = array<i64: 1, 16, 32>}, {transform_indices = @transform_2, window_bounds = array<i64: 1, 16, 1>}, {transform_indices = @transform_3, window_bounds = array<i64: 1, 16, 1>}, {transform_indices = @transform_4, window_bounds = array<i64: 1, 16, 1>}, {transform_indices = @transform_5, window_bounds = array<i64: 1, 16, 1024>}, {transform_indices = @transform_6, window_bounds = array<i64: 1, 16, 1>}]} {
    %c0_i32 = arith.constant 0 : i32
    %0 = arith.cmpi eq, %arg1, %c0_i32 : i32
    %1 = arith.extui %0 : i1 to i32
    %c0_i32_0 = arith.constant 0 : i32
    %2 = arith.cmpi ne, %1, %c0_i32_0 : i32
    scf.if %2 {
      %cst_28 = arith.constant 0.000000e+00 : f32
      %55 = vector.broadcast %cst_28 : f32 to vector<1x16x128xf32>
      %c0_29 = arith.constant 0 : index
      %c0_30 = arith.constant 0 : index
      %c0_31 = arith.constant 0 : index
      %56 = vector.load %arg9[%c0_29, %c0_30, %c0_31] : memref<1x16x128xf32, #tpu.memory_space<vmem>>, vector<1x16x128xf32>
      tpu.vector_store %arg9[%c0_29, %c0_30, %c0_31], %55 {strides = array<i32>} : memref<1x16x128xf32, #tpu.memory_space<vmem>>, vector<1x16x128xf32>,
    } else {
    }
    %c0 = arith.constant 0 : index
    %c0_1 = arith.constant 0 : index
    %c0_2 = arith.constant 0 : index
    %3 = vector.load %arg2[%c0, %c0_1, %c0_2] : memref<1x32x1024xf32, #tpu.memory_space<vmem>>, vector<1x32x1024xf32>
    %c0_3 = arith.constant 0 : index
    %c0_4 = arith.constant 0 : index
    %c0_5 = arith.constant 0 : index
    %4 = vector.load %arg3[%c0_3, %c0_4, %c0_5] : memref<1x16x32xf32, #tpu.memory_space<vmem>>, vector<1x16x32xf32>
    %c0_6 = arith.constant 0 : index
    %c0_7 = arith.constant 0 : index
    %c0_8 = arith.constant 0 : index
    %5 = vector.load %arg7[%c0_6, %c0_7, %c0_8] : memref<1x16x1024xf32, #tpu.memory_space<vmem>>, vector<1x16x1024xf32>
    "tpu.trace_start"() <{level = 10 : i32, message = "bkd,bdn->bkn"}> : () -> ()
    %cst = arith.constant dense<0.000000e+00> : vector<1x16x1024xf32>
    %6 = tpu.matmul %4, %3, %cst {dimension_numbers = #tpu.dot_dimension_numbers<[2], [1], [1], [2], [0, 0, 0, 1, 1, 2], [0], [0]>} : vector<1x16x32xf32>, vector<1x32x1024xf32>, vector<1x16x1024xf32> -> vector<1x16x1024xf32>
    "tpu.trace_stop"() : () -> ()
    %7 = arith.mulf %3, %3 : vector<1x32x1024xf32>
    %cst_9 = arith.constant dense<0.000000e+00> : vector<1x1024xf32>
    %8 = vector.multi_reduction <add>, %7, %cst_9 [1] : vector<1x32x1024xf32> to vector<1x1024xf32>
    %9 = vector.shape_cast %8 : vector<1x1024xf32> to vector<1x1x1024xf32>
    %c0_10 = arith.constant 0 : index
    %c0_11 = arith.constant 0 : index
    %c0_12 = arith.constant 0 : index
    %10 = vector.load %arg4[%c0_10, %c0_11, %c0_12] : memref<1x16x1xf32, #tpu.memory_space<vmem>>, vector<1x16x1xf32>
    %cst_13 = arith.constant 2.000000e+00 : f32
    %11 = vector.broadcast %cst_13 : f32 to vector<1x16x1024xf32>
    %12 = arith.mulf %11, %6 : vector<1x16x1024xf32>
    %13 = vector.broadcast %10 : vector<1x16x1xf32> to vector<1x16x1024xf32>
    %14 = arith.subf %13, %12 : vector<1x16x1024xf32>
    %15 = vector.broadcast %9 : vector<1x1x1024xf32> to vector<1x16x1024xf32>
    %16 = arith.addf %14, %15 : vector<1x16x1024xf32>
    %cst_14 = arith.constant 0.000000e+00 : f32
    %17 = vector.broadcast %cst_14 : f32 to vector<1x16x1024xf32>
    %18 = arith.maximumf %16, %17 : vector<1x16x1024xf32>
    %cst_15 = arith.constant dense<0xFF800000> : vector<1x1024xf32>
    %19 = vector.multi_reduction <maximumf>, %5, %cst_15 [1] : vector<1x16x1024xf32> to vector<1x1024xf32>
    %20 = vector.shape_cast %19 : vector<1x1024xf32> to vector<1x1x1024xf32>
    %21 = vector.broadcast %20 : vector<1x1x1024xf32> to vector<1x16x1024xf32>
    %22 = arith.subf %5, %21 : vector<1x16x1024xf32>
    %23 = math.exp %22 : vector<1x16x1024xf32>
    %cst_16 = arith.constant dense<0.000000e+00> : vector<1x1024xf32>
    %24 = vector.multi_reduction <add>, %23, %cst_16 [1] : vector<1x16x1024xf32> to vector<1x1024xf32>
    %25 = vector.shape_cast %24 : vector<1x1024xf32> to vector<1x1x1024xf32>
    %26 = tpu.reciprocal %25 {approx = true} : vector<1x1x1024xf32> -> vector<1x1x1024xf32>
    %27 = vector.broadcast %26 : vector<1x1x1024xf32> to vector<1x16x1024xf32>
    %28 = arith.mulf %23, %27 : vector<1x16x1024xf32>
    %c0_17 = arith.constant 0 : index
    %c0_18 = arith.constant 0 : index
    %c0_19 = arith.constant 0 : index
    %29 = vector.load %arg5[%c0_17, %c0_18, %c0_19] : memref<1x16x1xf32, #tpu.memory_space<vmem>>, vector<1x16x1xf32>
    %30 = vector.broadcast %29 : vector<1x16x1xf32> to vector<1x16x1024xf32>
    %31 = arith.mulf %18, %30 : vector<1x16x1024xf32>
    %32 = math.exp %31 : vector<1x16x1024xf32>
    %33 = arith.mulf %28, %32 : vector<1x16x1024xf32>
    %34 = vector.extract_strided_slice %33 {offsets = [0, 0, 0], sizes = [1, 16, 128], strides = [1, 1, 1]} : vector<1x16x1024xf32> to vector<1x16x128xf32>
    %35 = vector.extract_strided_slice %33 {offsets = [0, 0, 128], sizes = [1, 16, 128], strides = [1, 1, 1]} : vector<1x16x1024xf32> to vector<1x16x128xf32>
    %36 = arith.addf %34, %35 : vector<1x16x128xf32>
    %37 = vector.extract_strided_slice %33 {offsets = [0, 0, 256], sizes = [1, 16, 128], strides = [1, 1, 1]} : vector<1x16x1024xf32> to vector<1x16x128xf32>
    %38 = arith.addf %36, %37 : vector<1x16x128xf32>
    %39 = vector.extract_strided_slice %33 {offsets = [0, 0, 384], sizes = [1, 16, 128], strides = [1, 1, 1]} : vector<1x16x1024xf32> to vector<1x16x128xf32>
    %40 = arith.addf %38, %39 : vector<1x16x128xf32>
    %41 = vector.extract_strided_slice %33 {offsets = [0, 0, 512], sizes = [1, 16, 128], strides = [1, 1, 1]} : vector<1x16x1024xf32> to vector<1x16x128xf32>
    %42 = arith.addf %40, %41 : vector<1x16x128xf32>
    %43 = vector.extract_strided_slice %33 {offsets = [0, 0, 640], sizes = [1, 16, 128], strides = [1, 1, 1]} : vector<1x16x1024xf32> to vector<1x16x128xf32>
    %44 = arith.addf %42, %43 : vector<1x16x128xf32>
    %45 = vector.extract_strided_slice %33 {offsets = [0, 0, 768], sizes = [1, 16, 128], strides = [1, 1, 1]} : vector<1x16x1024xf32> to vector<1x16x128xf32>
    %46 = arith.addf %44, %45 : vector<1x16x128xf32>
    %47 = vector.extract_strided_slice %33 {offsets = [0, 0, 896], sizes = [1, 16, 128], strides = [1, 1, 1]} : vector<1x16x1024xf32> to vector<1x16x128xf32>
    %48 = arith.addf %46, %47 : vector<1x16x128xf32>
    %c0_20 = arith.constant 0 : index
    %c0_21 = arith.constant 0 : index
    %c0_22 = arith.constant 0 : index
    %49 = vector.load %arg9[%c0_20, %c0_21, %c0_22] : memref<1x16x128xf32, #tpu.memory_space<vmem>>, vector<1x16x128xf32>
    %50 = arith.addf %49, %48 : vector<1x16x128xf32>
    %c0_23 = arith.constant 0 : index
    %c0_24 = arith.constant 0 : index
    %c0_25 = arith.constant 0 : index
    %51 = vector.load %arg9[%c0_23, %c0_24, %c0_25] : memref<1x16x128xf32, #tpu.memory_space<vmem>>, vector<1x16x128xf32>
    tpu.vector_store %arg9[%c0_23, %c0_24, %c0_25], %50 {strides = array<i32>} : memref<1x16x128xf32, #tpu.memory_space<vmem>>, vector<1x16x128xf32>,
    %c0_i32_26 = arith.constant 0 : i32
    %52 = arith.cmpi eq, %arg1, %c0_i32_26 : i32
    %53 = arith.extui %52 : i1 to i32
    %c0_i32_27 = arith.constant 0 : i32
    %54 = arith.cmpi ne, %53, %c0_i32_27 : i32
    scf.if %54 {
      %c0_28 = arith.constant 0 : index
      %c0_29 = arith.constant 0 : index
      %c0_30 = arith.constant 0 : index
      %55 = vector.load %arg9[%c0_28, %c0_29, %c0_30] : memref<1x16x128xf32, #tpu.memory_space<vmem>>, vector<1x16x128xf32>
      %cst_31 = arith.constant dense<0.000000e+00> : vector<1x16xf32>
      %56 = vector.multi_reduction <add>, %55, %cst_31 [2] : vector<1x16x128xf32> to vector<1x16xf32>
      %57 = vector.shape_cast %56 : vector<1x16xf32> to vector<1x16x1xf32>
      %c0_32 = arith.constant 0 : index
      %c0_33 = arith.constant 0 : index
      %c0_34 = arith.constant 0 : index
      %58 = vector.load %arg6[%c0_32, %c0_33, %c0_34] : memref<1x16x1xf32, #tpu.memory_space<vmem>>, vector<1x16x1xf32>
      %59 = arith.mulf %57, %58 : vector<1x16x1xf32>
      %c0_35 = arith.constant 0 : index
      %c0_36 = arith.constant 0 : index
      %c0_37 = arith.constant 0 : index
      %60 = vector.load %arg8[%c0_35, %c0_36, %c0_37] : memref<1x16x1xf32, #tpu.memory_space<vmem>>, vector<1x16x1xf32>
      tpu.vector_store %arg8[%c0_35, %c0_36, %c0_37], %59 {strides = array<i32>} : memref<1x16x1xf32, #tpu.memory_space<vmem>>, vector<1x16x1xf32>,
    } else {
    }
    return
  }
  func.func @transform_0(%arg0: i32, %arg1: i32) -> (i32, i32, i32) {
    %c0_i32 = arith.constant 0 : i32
    %c0_i32_0 = arith.constant 0 : i32
    return %arg0, %c0_i32, %arg1 : i32, i32, i32
  }
  func.func @transform_1(%arg0: i32, %arg1: i32) -> (i32, i32, i32) {
    %c0_i32 = arith.constant 0 : i32
    %c0_i32_0 = arith.constant 0 : i32
    %c0_i32_1 = arith.constant 0 : i32
    return %arg0, %c0_i32, %c0_i32_0 : i32, i32, i32
  }
  func.func @transform_2(%arg0: i32, %arg1: i32) -> (i32, i32, i32) {
    %c0_i32 = arith.constant 0 : i32
    %c0_i32_0 = arith.constant 0 : i32
    %c0_i32_1 = arith.constant 0 : i32
    return %arg0, %c0_i32, %c0_i32_0 : i32, i32, i32
  }
  func.func @transform_3(%arg0: i32, %arg1: i32) -> (i32, i32, i32) {
    %c0_i32 = arith.constant 0 : i32
    %c0_i32_0 = arith.constant 0 : i32
    %c0_i32_1 = arith.constant 0 : i32
    return %arg0, %c0_i32, %c0_i32_0 : i32, i32, i32
  }
  func.func @transform_4(%arg0: i32, %arg1: i32) -> (i32, i32, i32) {
    %c0_i32 = arith.constant 0 : i32
    %c0_i32_0 = arith.constant 0 : i32
    %c0_i32_1 = arith.constant 0 : i32
    return %arg0, %c0_i32, %c0_i32_0 : i32, i32, i32
  }
  func.func @transform_5(%arg0: i32, %arg1: i32) -> (i32, i32, i32) {
    %c0_i32 = arith.constant 0 : i32
    %c0_i32_0 = arith.constant 0 : i32
    return %arg0, %c0_i32, %arg1 : i32, i32, i32
  }
  func.func @transform_6(%arg0: i32, %arg1: i32) -> (i32, i32, i32) {
    %c0_i32 = arith.constant 0 : i32
    %c0_i32_0 = arith.constant 0 : i32
    %c0_i32_1 = arith.constant 0 : i32
    return %arg0, %c0_i32, %c0_i32_0 : i32, i32, i32
  }
}

</mosaic_0001>

<bundles_post_ra>
// kernel: gmm_forward.1
= control target key start
LH: loop header
LB: loop body
LE: loop exit
PB: predicated region body
PF: predicated region fallthrough
CT: control target
= control target key end

     0   :  { %s1465_s21 = smov 0   ;;  %s1467_s22 = smov 0   ;;  %s1905_s0 = inlined_call_operand.vmem [shape: f32[2,32,1024], index: 0, kind: input, shape index: {}]   ;;  %s1906_s1 = inlined_call_operand.vmem [shape: f32[2,16,32], index: 1, kind: input, shape index: {}]   ;;  %s1907_s2 = inlined_call_operand.vmem [shape: f32[2,16,1], index: 2, kind: input, shape index: {}]   ;;  %s1908_s3 = inlined_call_operand.vmem [shape: f32[2,16,1], index: 3, kind: input, shape index: {}]   ;;  %s1909_s4 = inlined_call_operand.vmem [shape: f32[2,16,1], index: 4, kind: input, shape index: {}]   ;;  %s1910_s5 = inlined_call_operand.vmem [shape: f32[2,16,1024], index: 5, kind: input, shape index: {}]   ;;  %s1911_s6 = inlined_call_operand.vmem [shape: f32[2,16,1], index: 6, kind: output, shape index: {}]  }
   0x1   :  { %s1469_s23 = smov 0  }
   0x2 LB: > { %s28_s24 = sadd.s32 1, %s1423_s22  ;;  %p1258_p0 = scmp.ge.s32.totalorder %s1427_s23, 1  ;;  %s1427_s23 = sphi %s1469_s23, %s16_s23   ;;  %s1423_s22 = sphi %s1467_s22, %s1913_s22   ;;  %s1419_s21 = sphi %s1465_s21, %s1912_s21  }
   0x3   : > { %p30_p1 = scmp.ge.s32.totalorder %s28_s24, 2  ;;  %p288_p2 = scmp.lt.s32.totalorder %s1427_s23, 3 }
   0x5   : > { %s1915_s24 = smov (%p30_p1, %s28_s24), 0  ;;  %p289_p3 = pnand %p1258_p0, %p288_p2 }
   0x6   : > { %p352_p4 = scmp.lt.s32.totalorder (!%p289_p3), %s1419_s21, 1 }
   0x7   : > { %292 = sbr.rel (%p289_p3) target bundleno = 325 (0x145), region = 44 }
   0xc   : > { %v1429_v0 = vmov 0   ;;  %s1917_s21 = smov (!%p352_p4, %s1419_s21), 1  ;;  %vm452_vm0 = vcmask 261120   ;;  %vm1116_vm1 = vcmask 7168  }
   0xd   : > { %1323 = vset.pattern.permute.xlu0 %v1429_v0  ;;  %1324 = vset.pattern.permute.xlu1 %v1429_v0  ;;  %s1291_s25 = sshll.u32 %s1917_s21, 8  ;;  %s1495_s29 = sshll.u32 %s1917_s21, 4 }
   0xe   : > { %s1489_s28 = scalar_lea.vmem %s1905_s0, %s1291_s25  ;;  %s1510_s8 = scalar_lea.vmem %s1906_s1, %s1495_s29 }
   0xf   : > { %v426_v1 = vld [vmem:[%s1489_s28 + $0xc0] sm:$0xff]  ;;  %v427_v2 = vld [vmem:[%s1489_s28 + $0xc8] sm:$0xff]  ;;  %v428_v3 = vld [vmem:[%s1489_s28 + $0xd0] sm:$0xff]  ;;  %s1552_s11 = scalar_lea.vmem %s1907_s2, %s1495_s29  ;;  %s1559_s14 = scalar_lea.vmem %s1908_s3, %s1495_s29 }
  0x10   : > { %471 = vmatpush.msra.mxu0 %v426_v1  ;;  %494 = vmatpush.msra.mxu1 %v427_v2  ;;  %v429_v4 = vld [vmem:[%s1489_s28 + $0xd8] sm:$0xff]  ;;  %v418_v5 = vld [vmem:[%s1489_s28 + $0x80] sm:$0xff]  ;;  %v419_v6 = vld [vmem:[%s1489_s28 + $0x88] sm:$0xff]  ;;  %v667_v7 = vmul.f32 %v426_v1, %v426_v1  ;;  %v668_v8 = vmul.f32 %v427_v2, %v427_v2  ;;  %v669_v29 = vmul.f32 %v428_v3, %v428_v3  ;;  %s1296_s15 = sshll.u32 %s1917_s21, 7  ;;  %s380_s21 = scalar_lea.vmem %s1909_s4, %s1495_s29 }
  0x11   : > { %517 = vmatpush.msra.mxu2 %v428_v3  ;;  %540 = vmatpush.msra.mxu3 %v429_v4  ;;  %v659_v9 = vmul.f32 %v418_v5, %v418_v5  ;;  %v420_v10 = vld [vmem:[%s1489_s28 + $0x90] sm:$0xff]  ;;  %v421_v11 = vld [vmem:[%s1489_s28 + $0x98] sm:$0xff]  ;;  %v410_v12 = vld [vmem:[%s1489_s28 + $0x40] sm:$0xff]  ;;  %v660_v13 = vmul.f32 %v419_v6, %v419_v6  ;;  %v670_v36 = vmul.f32 %v429_v4, %v429_v4  ;;  %s1596_s18 = scalar_lea.vmem %s1910_s5, %s1296_s15  ;;  %s395_s27 = scalar_lea.vmem %s1911_s6, %s1495_s29 }
  0x12   : > { %472 = vmatpush.msra.mxu0 %v418_v5  ;;  %495 = vmatpush.msra.mxu1 %v419_v6  ;;  %v661_v14 = vmul.f32 %v420_v10, %v420_v10  ;;  %v651_v15 = vmul.f32 %v410_v12, %v410_v12  ;;  %v411_v16 = vld [vmem:[%s1489_s28 + $0x48] sm:$0xff]  ;;  %v412_v17 = vld [vmem:[%s1489_s28 + $0x50] sm:$0xff]  ;;  %v413_v18 = vld [vmem:[%s1489_s28 + $0x58] sm:$0xff]  ;;  %v662_v30 = vmul.f32 %v421_v11, %v421_v11 }
  0x13   : > { %518 = vmatpush.msra.mxu2 %v420_v10  ;;  %541 = vmatpush.msra.mxu3 %v421_v11  ;;  %v652_v19 = vmul.f32 %v411_v16, %v411_v16  ;;  %v653_v20 = vmul.f32 %v412_v17, %v412_v17  ;;  %v654_v21 = vmul.f32 %v413_v18, %v413_v18  ;;  %v402_v22 = vld [vmem:[%s1489_s28] sm:$0xff]  ;;  %v403_v23 = vld [vmem:[%s1489_s28 + $0x8] sm:$0xff]  ;;  %v404_v24 = vld [vmem:[%s1489_s28 + $0x10] sm:$0xff] }
  0x14   : > { %473 = vmatpush.msra.mxu0 %v410_v12  ;;  %496 = vmatpush.msra.mxu1 %v411_v16  ;;  %v643_v25 = vmul.f32 %v402_v22, %v402_v22  ;;  %v644_v26 = vmul.f32 %v403_v23, %v403_v23  ;;  %v645_v27 = vmul.f32 %v404_v24, %v404_v24  ;;  %v405_v28 = vld [vmem:[%s1489_s28 + $0x18] sm:$0xff]  ;;  %v1517_v32 = vld [vmem:[%s1510_s8] sm:$0xff]  ;;  %v432_v38 = vld [vmem:[%s1489_s28 + $0xf0] sm:$0xff] }
  0x15   : > { %519 = vmatpush.msra.mxu2 %v412_v17  ;;  %542 = vmatpush.msra.mxu3 %v413_v18  ;;  %v646_v31 = vmul.f32 %v405_v28, %v405_v28  ;;  %v430_v39 = vld [vmem:[%s1489_s28 + $0xe0] sm:$0xff]  ;;  %v433_v43 = vld [vmem:[%s1489_s28 + $0xf8] sm:$0xff]  ;;  %v431_v44 = vld [vmem:[%s1489_s28 + $0xe8] sm:$0xff]  ;;  %v673_v58 = vmul.f32 %v432_v38, %v432_v38 }
  0x16   : > { %474 = vmatpush.msra.mxu0 %v402_v22  ;;  %v675_v33 = vadd.f32 %v651_v15, %v643_v25  ;;  %497 = vmatpush.msra.mxu1 %v403_v23  ;;  %v684_v34 = vadd.f32 %v652_v19, %v644_v26  ;;  %v693_v35 = vadd.f32 %v653_v20, %v645_v27  ;;  %v424_v46 = vld [vmem:[%s1489_s28 + $0xb0] sm:$0xff]  ;;  %v422_v47 = vld [vmem:[%s1489_s28 + $0xa0] sm:$0xff]  ;;  %v425_v51 = vld [vmem:[%s1489_s28 + $0xb8] sm:$0xff] }
  0x17   : > { %520 = vmatpush.msra.mxu2 %v404_v24  ;;  %543 = vmatpush.msra.mxu3 %v405_v28  ;;  %v702_v37 = vadd.f32 %v654_v21, %v646_v31  ;;  %v423_v52 = vld [vmem:[%s1489_s28 + $0xa8] sm:$0xff]  ;;  %v416_v54 = vld [vmem:[%s1489_s28 + $0x70] sm:$0xff]  ;;  %v414_v55 = vld [vmem:[%s1489_s28 + $0x60] sm:$0xff]  ;;  %v671_v59 = vmul.f32 %v430_v39, %v430_v39  ;;  %v665_v62 = vmul.f32 %v424_v46, %v424_v46 }
  0x18   : > { %v676_v40 = vadd.f32 %v675_v33, %v659_v9  ;;  %v685_v41 = vadd.f32 %v684_v34, %v660_v13  ;;  %v694_v42 = vadd.f32 %v693_v35, %v661_v14  ;;  %1273 = vmatmul.msk.f32.vlgmr.msra.gmra.mxu0 %vm452_vm0, %v1517_v32  ;;  %1275 = vmatmul.msk.f32.vlgmr.msra.gmra.mxu1 %vm452_vm0, %v1517_v32  ;;  %v417_v56 = vld [vmem:[%s1489_s28 + $0x78] sm:$0xff]  ;;  %v415_v57 = vld [vmem:[%s1489_s28 + $0x68] sm:$0xff]  ;;  %v408_v1 = vld [vmem:[%s1489_s28 + $0x30] sm:$0xff] }
  0x19   : > { %v703_v45 = vadd.f32 %v702_v37, %v662_v30  ;;  %1277 = vmatmul.msk.f32.vlgmr.msra.gmra.mxu2 %vm452_vm0, %v1517_v32  ;;  %1279 = vmatmul.msk.f32.vlgmr.msra.gmra.mxu3 %vm452_vm0, %v1517_v32  ;;  %v435_v60 = vld [vmem:[%s1510_s8 + $0x8] sm:$0xff]  ;;  %v657_v61 = vmul.f32 %v416_v54, %v416_v54  ;;  %v663_v63 = vmul.f32 %v422_v47, %v422_v47  ;;  %v406_v5 = vld [vmem:[%s1489_s28 + $0x20] sm:$0xff]  ;;  %v409_v6 = vld [vmem:[%s1489_s28 + $0x38] sm:$0xff] }
  0x1a   : > { %v1533_v48 = vadd.f32 %v676_v40, %v667_v7  ;;  %v1535_v49 = vadd.f32 %v685_v41, %v668_v8  ;;  %v1537_v50 = vadd.f32 %v694_v42, %v669_v29  ;;  %609 = vmatpush.msrb.mxu2 %v432_v38  ;;  %563 = vmatpush.msrb.mxu0 %v430_v39  ;;  %v747_v10 = vld [vmem:[%s1552_s11] sm:$0xff]  ;;  %v407_v11 = vld [vmem:[%s1489_s28 + $0x28] sm:$0xff]  ;;  %v1609_v38 = vld [vmem:[%s1596_s18 + $0x10] sm:$0xff] }
  0x1b   : > { %v1541_v53 = vadd.f32 %v703_v45, %v670_v36  ;;  %632 = vmatpush.msrb.mxu3 %v433_v43  ;;  %586 = vmatpush.msrb.mxu1 %v431_v44  ;;  %v655_v0 = vmul.f32 %v414_v55, %v414_v55  ;;  %v658_v2 = vmul.f32 %v417_v56, %v417_v56  ;;  %v1007_v15 = vld [vmem:[%s1559_s14] sm:$0xff]  ;;  %v748_v29 = vld [vmem:[%s1552_s11 + $0x8] sm:$0xff]  ;;  %v1612_v39 = vld [vmem:[%s1596_s18 + $0x50] sm:$0xff] }
  0x1c   : > { %610 = vmatpush.msrb.mxu2 %v424_v46  ;;  %564 = vmatpush.msrb.mxu0 %v422_v47  ;;  %v656_v3 = vmul.f32 %v415_v57, %v415_v57  ;;  %v649_v4 = vmul.f32 %v408_v1, %v408_v1  ;;  %v666_v7 = vmul.f32 %v425_v51, %v425_v51  ;;  %v1008_v30 = vld [vmem:[%s1559_s14 + $0x8] sm:$0xff]  ;;  %v436_v31 = vld [vmem:[%s1596_s18] sm:$0xff] }
  0x1d   : > { %633 = vmatpush.msrb.mxu3 %v425_v51  ;;  %587 = vmatpush.msrb.mxu1 %v423_v52  ;;  %v647_v8 = vmul.f32 %v406_v5, %v406_v5  ;;  %v650_v9 = vmul.f32 %v409_v6, %v409_v6  ;;  %v664_v12 = vmul.f32 %v423_v52, %v423_v52  ;;  %v444_v33 = vld [vmem:[%s1596_s18 + $0x40] sm:$0xff]  ;;  %v1604_v34 = vld [vmem:[%s1596_s18 + $0x48] sm:$0xff] }
  0x1e   : > { %611 = vmatpush.msrb.mxu2 %v416_v54  ;;  %565 = vmatpush.msrb.mxu0 %v414_v55  ;;  %v729_v13 = vadd.f32 %v657_v61, %v649_v4  ;;  %v648_v14 = vmul.f32 %v407_v11, %v407_v11  ;;  %v674_v16 = vmul.f32 %v433_v43, %v433_v43  ;;  %v1617_v43 = vld [vmem:[%s1596_s18 + $0x18] sm:$0xff] }
  0x1f   : > { %634 = vmatpush.msrb.mxu3 %v417_v56  ;;  %588 = vmatpush.msrb.mxu1 %v415_v57  ;;  %v672_v17 = vmul.f32 %v431_v44, %v431_v44  ;;  %v711_v18 = vadd.f32 %v655_v0, %v647_v8  ;;  %v738_v20 = vadd.f32 %v658_v2, %v650_v9  ;;  %v1620_v44 = vld [vmem:[%s1596_s18 + $0x58] sm:$0xff]  ;;  %v678_v57 = vrot.slane %v1533_v48, 4  ;;  %v1636_v8 = vld [vmem:[%s1596_s18 + $0x60] sm:$0xff] }
  0x20   : > { %1274 = vmatmul.msk.f32.gmra.mxu0 %vm452_vm0, %v435_v60  ;;  %1276 = vmatmul.msk.f32.gmra.mxu1 %vm452_vm0, %v435_v60  ;;  %v730_v19 = vadd.f32 %v729_v13, %v665_v62  ;;  %v720_v21 = vadd.f32 %v656_v3, %v648_v14  ;;  %v823_v35 = vmax.f32 %v436_v31, %v444_v33 }
  0x21   : > { %1278 = vmatmul.msk.f32.gmra.mxu2 %vm452_vm0, %v435_v60  ;;  %1280 = vmatmul.msk.f32.gmra.mxu3 %vm452_vm0, %v435_v60  ;;  %v712_v22 = vadd.f32 %v711_v18, %v663_v63  ;;  %v739_v24 = vadd.f32 %v738_v20, %v666_v7  ;;  %v837_v42 = vmax.f32 %v1609_v38, %v1612_v39  ;;  %v1633_v7 = vld [vmem:[%s1596_s18 + $0x28] sm:$0xff] }
  0x22   : > { %612 = vmatpush.msrb.mxu2 %v408_v1  ;;  %566 = vmatpush.msrb.mxu0 %v406_v5  ;;  %v1570_v23 = vadd.f32 %v730_v19, %v673_v58  ;;  %v721_v25 = vadd.f32 %v720_v21, %v664_v12  ;;  %v824_v37 = vrot.slane %v823_v35, 4  ;;  %v844_v51 = vmax.f32 %v1617_v43, %v1620_v44 }
  0x23   : > { %635 = vmatpush.msrb.mxu3 %v409_v6  ;;  %767 = vperm.xlu0 %1323, %v747_v10   ;;  %v1572_v26 = vadd.f32 %v712_v22, %v671_v59  ;;  %v1574_v27 = vadd.f32 %v739_v24, %v674_v16  ;;  %v838_v47 = vrot.slane %v837_v42, 4  ;;  %v687_v58 = vrot.slane %v1535_v49, 4  ;;  %v1630_v6 = vld [vmem:[%s1596_s18 + $0x20] sm:$0xff]  ;;  %v1639_v10 = vld [vmem:[%s1596_s18 + $0x68] sm:$0xff] }
  0x24   : > { %589 = vmatpush.msrb.mxu1 %v407_v11  ;;  %1011 = vperm.xlu1 %1324, %v1007_v15   ;;  %v1576_v28 = vadd.f32 %v721_v25, %v672_v17  ;;  %v825_v41 = vmax.f32 %v823_v35, %v824_v37  ;;  %v845_v56 = vrot.slane %v844_v51, 4  ;;  %v679_v3 = vadd.f32 %v678_v57, %v1533_v48 }
  0x25   : > { %v839_v55 = vmax.f32 %v837_v42, %v838_v47  ;;  %v688_v4 = vadd.f32 %v687_v58, %v1535_v49  ;;  %v696_v5 = vrot.slane %v1537_v50, 4  ;;  %v851_v13 = vmax.f32 %v1630_v6, %v1636_v8 }
  0x26   : > { %v826_v46 = vrot.slane %v825_v41, 2  ;;  %v846_v62 = vmax.f32 %v844_v51, %v845_v56  ;;  %v705_v48 = vrot.slane %v1541_v53, 4  ;;  %v858_v49 = vmax.f32 %v1633_v7, %v1639_v10 }
  0x27   : > { %v840_v61 = vrot.slane %v839_v55, 2  ;;  %v852_v19 = vrot.slane %v851_v13, 4  ;;  %v680_v21 = vrot.slane %v679_v3, 2  ;;  %v689_v22 = vrot.slane %v688_v4, 2 }
  0x28   : > { %1281 = vmatmul.msk.f32.vlgmr.msrb.gmra.mxu0 %vm452_vm0, %v1517_v32  ;;  %1283 = vmatmul.msk.f32.vlgmr.msrb.gmra.mxu1 %vm452_vm0, %v1517_v32  ;;  %v827_v54 = vmax.f32 %v825_v41, %v826_v46  ;;  %v847_v2 = vrot.slane %v846_v62, 2  ;;  %v1648_v24 = vadd.f32 %v696_v5, %v1537_v50  ;;  %v859_v25 = vrot.slane %v858_v49, 4  ;;  %v1663_v50 = vld [vmem:[%s1596_s18 + $0x78] sm:$0xff] }
  0x29   : > { %1285 = vmatmul.msk.f32.vlgmr.msrb.gmra.mxu2 %vm452_vm0, %v1517_v32  ;;  %1287 = vmatmul.msk.f32.vlgmr.msrb.gmra.mxu3 %vm452_vm0, %v1517_v32  ;;  %v1600_v32 = vld [vmem:[%s1596_s18 + $0x8] sm:$0xff]  ;;  %v841_v1 = vmax.f32 %v839_v55, %v840_v61  ;;  %v1671_v56 = vadd.f32 %v680_v21, %v679_v3  ;;  %v1678_v3 = vadd.f32 %v705_v48, %v1541_v53 }
  0x2a   : > { %v830_v36 = vmax.f32 %v1600_v32, %v1604_v34  ;;  %v848_v12 = vmax.f32 %v846_v62, %v847_v2  ;;  %v860_v37 = vmax.f32 %v858_v49, %v859_v25  ;;  %v1673_v62 = vadd.f32 %v689_v22, %v688_v4 }
  0x2b   : > { %772 = vperm.xlu0 %1323, %v748_v29   ;;  %v842_v11 = vrot.slane %v841_v1, 1  ;;  %v682_v4 = vrot.slane %v1671_v56, 1 }
  0x2c   : > { %1016 = vperm.xlu1 %1324, %v1008_v30   ;;  %v831_v40 = vrot.slane %v830_v36, 4  ;;  %v849_v18 = vrot.slane %v848_v12, 1  ;;  %v853_v30 = vmax.f32 %v851_v13, %v852_v19  ;;  %v861_v47 = vrot.slane %v860_v37, 2 }
  0x2d   : > { %v843_v17 = vmax.f32 %v841_v1, %v842_v11  ;;  %v691_v48 = vrot.slane %v1673_v62, 1 }
  0x2e   : > { %v832_v45 = vmax.f32 %v830_v36, %v831_v40  ;;  %v850_v29 = vmax.f32 %v848_v12, %v849_v18  ;;  %v1652_v36 = vld [vmem:[%s1596_s18 + $0x30] sm:$0xff]  ;;  %v862_v57 = vmax.f32 %v860_v37, %v861_v47 }
  0x2f   : > { %v889_v41 = vsub.f32 %v1612_v39, %v843_v17 }
  0x30   : > { %1282 = vmatmul.msk.f32.gmra.mxu0 %vm452_vm0, %v435_v60  ;;  %1284 = vmatmul.msk.f32.gmra.mxu1 %vm452_vm0, %v435_v60  ;;  %v833_v52 = vrot.slane %v832_v45, 2 }
  0x31   : > { %1286 = vmatmul.msk.f32.gmra.mxu2 %vm452_vm0, %v435_v60  ;;  %1288 = vmatmul.msk.f32.gmra.mxu3 %vm452_vm0, %v435_v60  ;;  %v828_v60 = vrot.slane %v827_v54, 1 }
  0x32   : > { %v834_v59 = vmax.f32 %v832_v45, %v833_v52  ;;  %v854_v45 = vrot.slane %v853_v30, 2  ;;  %v890_v52 = vsub.f32 %v1620_v44, %v850_v29 }
  0x33   : > { %v829_v0 = vmax.f32 %v827_v54, %v828_v60 }
  0x34   : > { %v835_v63 = vrot.slane %v834_v59, 1  ;;  %v917_v5 = vmul.f32 1.442695, %v890_v52 }
  0x35   : > { %v879_v14 = vsub.f32 %v436_v31, %v829_v0  ;;  %v887_v16 = vsub.f32 %v444_v33, %v829_v0  ;;  %v881_v31 = vsub.f32 %v1609_v38, %v843_v17  ;;  %v1658_v33 = vld [vmem:[%s1596_s18 + $0x70] sm:$0xff]  ;;  %v882_v38 = vsub.f32 %v1617_v43, %v850_v29 }
  0x36   : > { %v836_v9 = vmax.f32 %v834_v59, %v835_v63  ;;  %v865_v46 = vmax.f32 %v1652_v36, %v1658_v33  ;;  %v915_v43 = vmul.f32 1.442695, %v889_v41  ;;  %v863_v63 = vrot.slane %v862_v57, 1 }
  0x37   : > { %v895_v20 = vmul.f32 1.442695, %v879_v14  ;;  %v911_v35 = vmul.f32 1.442695, %v887_v16  ;;  %v899_v54 = vmul.f32 1.442695, %v881_v31 }
  0x38   : > { %v880_v15 = vsub.f32 %v1600_v32, %v836_v9  ;;  %v1655_v32 = vld [vmem:[%s1596_s18 + $0x38] sm:$0xff]  ;;  %v888_v40 = vsub.f32 %v1604_v34, %v836_v9  ;;  %v855_v34 = vmax.f32 %v853_v30, %v854_v45  ;;  %v866_v55 = vrot.slane %v865_v46, 4 }
  0x39   : > { %1325 = vpow2.f32 %v895_v20  ;;  %v872_v51 = vmax.f32 %v1655_v32, %v1663_v50  ;;  %v901_v39 = vmul.f32 1.442695, %v882_v38  ;;  %v864_v9 = vmax.f32 %v862_v57, %v863_v63 }
  0x3a   : > { %v897_v42 = vmul.f32 1.442695, %v880_v15  ;;  %1327 = vpow2.f32 %v911_v35  ;;  %v913_v59 = vmul.f32 1.442695, %v888_v40  ;;  %v856_v60 = vrot.slane %v855_v34, 1 }
  0x3b   : > { %v873_v58 = vrot.slane %v872_v51, 4  ;;  %v867_v61 = vmax.f32 %v865_v46, %v866_v55  ;;  %v884_v15 = vsub.f32 %v1633_v7, %v864_v9  ;;  %v892_v17 = vsub.f32 %v1639_v10, %v864_v9 }
  0x3c   : > { %1329 = vpow2.f32 %v897_v42  ;;  %v857_v1 = vmax.f32 %v855_v34, %v856_v60  ;;  %v714_v10 = vrot.slane %v1572_v26, 4  ;;  %v741_v41 = vrot.slane %v1574_v27, 4 }
  0x3d   : > { %v874_v0 = vmax.f32 %v872_v51, %v873_v58  ;;  %1331 = vpow2.f32 %v899_v54  ;;  %v868_v2 = vrot.slane %v867_v61, 2  ;;  %v905_v22 = vmul.f32 1.442695, %v884_v15 }
  0x3e   : > { %1333 = vpow2.f32 %v901_v39  ;;  %v883_v14 = vsub.f32 %v1630_v6, %v857_v1  ;;  %v891_v16 = vsub.f32 %v1636_v8, %v857_v1  ;;  %v732_v8 = vrot.slane %v1570_v23, 4 }
  0x3f   : > { %v1675_v44 = vpop.eup %1325  ;;  %v875_v11 = vrot.slane %v874_v0, 2  ;;  %1335 = vpow2.f32 %v913_v59  ;;  %v869_v13 = vmax.f32 %v867_v61, %v868_v2  ;;  %v921_v35 = vmul.f32 1.442695, %v892_v17 }
  0x40   : > { %v1680_v12 = vpop.eup %1327  ;;  %1337 = vpow2.f32 %v915_v43  ;;  %v903_v19 = vmul.f32 1.442695, %v883_v14  ;;  %v919_v6 = vmul.f32 1.442695, %v891_v16  ;;  %v1710_v52 = vadd.f32 %v732_v8, %v1570_v23 }
  0x41   : > { %v876_v49 = vmax.f32 %v874_v0, %v875_v11  ;;  %v870_v18 = vrot.slane %v869_v13, 1  ;;  %1339 = vpow2.f32 %v917_v5  ;;  %v927_v25 = vadd.f32 %v1680_v12, %v1675_v44 }
  0x42   : > { %v1687_v53 = vpop.eup %1329  ;;  %1341 = vpow2.f32 %v903_v19  ;;  %v723_v54 = vrot.slane %v1576_v28, 4  ;;  %v698_v58 = vrot.slane %v1648_v24, 2 }
  0x43   : > { %v1690_v20 = vpop.eup %1331  ;;  %v877_v21 = vrot.slane %v876_v49, 1  ;;  %v871_v29 = vmax.f32 %v869_v13, %v870_v18  ;;  %1343 = vpow2.f32 %v905_v22  ;;  %v928_v37 = vrot.slane %v927_v25, 4 }
  0x44   : > { %v1694_v7 = vpop.eup %1333  ;;  %1345 = vpow2.f32 %v919_v6  ;;  %v724_v0 = vadd.f32 %v723_v54, %v1576_v28  ;;  %v699_v13 = vadd.f32 %v698_v58, %v1648_v24  ;;  %v1742_v18 = vadd.f32 %v682_v4, %v1671_v56 }
  0x45   : > { %v1698_v30 = vpop.eup %1335  ;;  %v878_v31 = vmax.f32 %v876_v49, %v877_v21  ;;  %v885_v42 = vsub.f32 %v1652_v36, %v871_v29  ;;  %v893_v45 = vsub.f32 %v1658_v33, %v871_v29  ;;  %1347 = vpow2.f32 %v921_v35 }
  0x46   : > { %v1700_v40 = vpop.eup %1337  ;;  %v929_v47 = vadd.f32 %v928_v37, %v927_v25  ;;  %v715_v36 = vadd.f32 %v714_v10, %v1572_v26  ;;  %v725_v25 = vrot.slane %v724_v0, 2 }
  0x47   : > { %v886_v46 = vsub.f32 %v1655_v32, %v878_v31  ;;  %v894_v38 = vsub.f32 %v1663_v50, %v878_v31  ;;  %v1707_v51 = vpop.eup %1339  ;;  %v907_v34 = vmul.f32 1.442695, %v885_v42  ;;  %v923_v55 = vmul.f32 1.442695, %v893_v45 }
  0x48   : > { %v930_v33 = vrot.slane %v929_v47, 2  ;;  %v934_v32 = vadd.f32 %v1698_v30, %v1687_v53  ;;  %v1716_v57 = vpop.eup %1341  ;;  %v1719_v50 = vadd.f32 %v741_v41, %v1574_v27  ;;  %v941_v59 = vadd.f32 %v1700_v40, %v1690_v20 }
  0x49   : > { %v909_v39 = vmul.f32 1.442695, %v886_v46  ;;  %v925_v23 = vmul.f32 1.442695, %v894_v38  ;;  %v1724_v60 = vpop.eup %1343  ;;  %1349 = vpow2.f32 %v907_v34  ;;  %v948_v43 = vadd.f32 %v1707_v51, %v1694_v7 }
  0x4a   : > { %v931_v26 = vadd.f32 %v930_v33, %v929_v47  ;;  %v935_v61 = vrot.slane %v934_v32, 4  ;;  %v1728_v63 = vpop.eup %1345  ;;  %v707_v27 = vrot.slane %v1678_v3, 2  ;;  %1351 = vpow2.f32 %v923_v55 }
  0x4b   : > { %v942_v1 = vrot.slane %v941_v59, 4  ;;  %v1732_v2 = vpop.eup %1347  ;;  %v716_v5 = vrot.slane %v715_v36, 2  ;;  %1353 = vpow2.f32 %v909_v39  ;;  %v949_v11 = vrot.slane %v948_v43, 4 }
  0x4c   : > { %v936_v9 = vadd.f32 %v935_v61, %v934_v32  ;;  %1355 = vpow2.f32 %v925_v23  ;;  %v955_v49 = vadd.f32 %v1728_v63, %v1716_v57  ;;  %v932_v15 = vrot.slane %v931_v26, 1 }
  0x4d   : > { %v943_v14 = vadd.f32 %v942_v1, %v941_v59  ;;  %v950_v28 = vadd.f32 %v949_v11, %v948_v43  ;;  %v962_v17 = vadd.f32 %v1732_v2, %v1724_v60  ;;  %v708_v19 = vadd.f32 %v707_v27, %v1678_v3 }
  0x4e   : > { %v937_v16 = vrot.slane %v936_v9, 2  ;;  %v956_v24 = vrot.slane %v955_v49, 4  ;;  %v717_v6 = vadd.f32 %v716_v5, %v715_v36  ;;  %v1752_v31 = vadd.f32 %v691_v48, %v1673_v62 }
  0x4f   : > { %v944_v21 = vrot.slane %v943_v14, 2  ;;  %v1745_v22 = vpop.eup %1349  ;;  %v951_v10 = vrot.slane %v950_v28, 2  ;;  %v963_v4 = vrot.slane %v962_v17, 4  ;;  %v700_v3 = vrot.slane %v699_v13, 1 }
  0x50   : > { %v938_v8 = vadd.f32 %v937_v16, %v936_v9  ;;  %v1747_v29 = vpop.eup %1351  ;;  %v957_v56 = vadd.f32 %v956_v24, %v955_v49  ;;  %v734_v41 = vrot.slane %v1710_v52, 2  ;;  %v743_v42 = vrot.slane %v1719_v50, 2 }
  0x51   : > { %v945_v35 = vadd.f32 %v944_v21, %v943_v14  ;;  %v1754_v37 = vpop.eup %1353  ;;  %v933_v45 = vadd.f32 %v932_v15, %v931_v26  ;;  %v952_v38 = vadd.f32 %v951_v10, %v950_v28  ;;  %v964_v54 = vadd.f32 %v963_v4, %v962_v17 }
  0x52   : > { %v1758_v46 = vpop.eup %1355  ;;  %v958_v47 = vrot.slane %v957_v56, 2  ;;  %v969_v62 = vadd.f32 %v1747_v29, %v1745_v22  ;;  %v709_v48 = vrot.slane %v708_v19, 1  ;;  %v718_v34 = vrot.slane %v717_v6, 1 }
  0x53   : > { %v726_v55 = vadd.f32 %v725_v25, %v724_v0  ;;  %v939_v36 = vrot.slane %v938_v8, 1  ;;  %v946_v39 = vrot.slane %v945_v35, 1  ;;  %v965_v32 = vrot.slane %v964_v54, 2 }
  0x54   : > { %v959_v33 = vadd.f32 %v958_v47, %v957_v56  ;;  %v970_v58 = vrot.slane %v969_v62, 4  ;;  %v1762_v23 = vadd.f32 %v700_v3, %v699_v13  ;;  %v735_v59 = vadd.f32 %v734_v41, %v1710_v52 }
  0x55   : > { %v976_v26 = vadd.f32 %v1758_v46, %v1754_v37  ;;  %1357 = vrcp.f32 %v933_v45  ;;  %v744_v61 = vadd.f32 %v743_v42, %v1719_v50  ;;  %v953_v43 = vrot.slane %v952_v38, 1 }
  0x56   : > { %v966_v27 = vadd.f32 %v965_v32, %v964_v54  ;;  %v971_v1 = vadd.f32 %v970_v58, %v969_v62  ;;  %v1768_v5 = vadd.f32 %v709_v48, %v708_v19  ;;  %v727_v0 = vrot.slane %v726_v55, 1 }
  0x57   : > { %v940_v9 = vadd.f32 %v939_v36, %v938_v8  ;;  %v977_v11 = vrot.slane %v976_v26, 4  ;;  %v1770_v13 = vadd.f32 %v718_v34, %v717_v6  ;;  %v947_v15 = vadd.f32 %v946_v39, %v945_v35 }
  0x58   : > { %v960_v52 = vrot.slane %v959_v33, 1  ;;  %v972_v16 = vrot.slane %v971_v1, 2  ;;  %v736_v50 = vrot.slane %v735_v59, 1  ;;  %v745_v25 = vrot.slane %v744_v61, 1 }
  0x59   : > { %v978_v24 = vadd.f32 %v977_v11, %v976_v26  ;;  %v954_v10 = vadd.f32 %v953_v43, %v952_v38  ;;  %v967_v19 = vrot.slane %v966_v27, 1  ;;  %1359 = vrcp.f32 %v940_v9 }
  0x5a   : > { %v973_v56 = vadd.f32 %v972_v16, %v971_v1  ;;  %v1778_v41 = vadd.f32 %v727_v0, %v726_v55  ;;  %v961_v42 = vadd.f32 %v960_v52, %v959_v33  ;;  %1361 = vrcp.f32 %v947_v15 }
  0x5b   : > { %v1358_v4 = vpop.eup %1357  ;;  %v979_v6 = vrot.slane %v978_v24, 2  ;;  %v1782_v54 = vadd.f32 %v736_v50, %v735_v59  ;;  %v1784_v48 = vadd.f32 %v745_v25, %v744_v61  ;;  %v968_v34 = vadd.f32 %v967_v19, %v966_v27 }
  0x5c   : > { %v974_v45 = vrot.slane %v973_v56, 1  ;;  %1363 = vrcp.f32 %v954_v10  ;;  %v1787_v36 = vmul.f32 %v1358_v4, %v1675_v44  ;;  %v1790_v26 = vmul.f32 %v1358_v4, %v1680_v12 }
  0x5d   : > { %v980_v62 = vadd.f32 %v979_v6, %v978_v24  ;;  %1365 = vrcp.f32 %v961_v42 }
  0x5e   : > { %v975_v9 = vadd.f32 %v974_v45, %v973_v56  ;;  %1367 = vrcp.f32 %v968_v34 }
  0x5f   : > { %v981_v58 = vrot.slane %v980_v62, 1  ;;  %v1360_v61 = vpop.eup %1359 }
  0x60   : > { %v1362_v15 = vpop.eup %1361  ;;  %1369 = vrcp.f32 %v975_v9  ;;  %v992_v56 = vmul.f32 %v1360_v61, %v1687_v53 }
  0x61   : > { %v982_v16 = vadd.f32 %v981_v58, %v980_v62 }
  0x62   : > { %v1800_v25 = vpop.eup %1363 }
  0x63   : > { %v1810_v6 = vpop.eup %1365 }
  0x95   : > { %v476_v14 = vpop.f32.mrf.mxu0  ;;  %v499_v49 = vpop.f32.mrf.mxu1 }
  0x96   : > { %v749_v28 = vmul.f32 2.0, %v476_v14  ;;  %v750_v17 = vmul.f32 2.0, %v499_v49  ;;  %v1772_v21 = vpop.permute.xlu0 %767  ;;  %v1776_v35 = vpop.permute.xlu1 %1011 }
  0x98   : > { %v775_v8 = vsub.f32 %v1772_v21, %v749_v28  ;;  %v776_v3 = vsub.f32 %v1772_v21, %v750_v17 }
  0x9a   : > { %v791_v47 = vadd.f32 %v775_v8, %v1742_v18  ;;  %v792_v38 = vadd.f32 %v776_v3, %v1752_v31  ;;  %v1808_v3 = vmul.f32 %v1362_v15, %v1690_v20  ;;  %v1820_v20 = vpop.eup %1367 }
  0x9b   : > { %v1826_v9 = vpop.eup %1369 }
  0x9c   : > { %v522_v39 = vpop.f32.mrf.mxu2  ;;  %v545_v55 = vpop.f32.mrf.mxu3  ;;  %v807_v32 = vmax.f32 %v791_v47, 0.0  ;;  %v808_v33 = vmax.f32 %v792_v38, 0.0  ;;  %v1815_v38 = vmul.f32 %v1360_v61, %v1698_v30 }
  0x9d   : > { %v751_v43 = vmul.f32 2.0, %v522_v39  ;;  %v752_v1 = vmul.f32 2.0, %v545_v55  ;;  %v479_v59 = vpop.f32.mrf.mxu0  ;;  %v502_v0 = vpop.f32.mrf.mxu1 }
  0x9e   : > { %v757_v27 = vmul.f32 2.0, %v479_v59  ;;  %v758_v11 = vmul.f32 2.0, %v502_v0  ;;  %v1019_v44 = vmul.f32 %v1776_v35, %v807_v32  ;;  %v1020_v14 = vmul.f32 %v1776_v35, %v808_v33  ;;  %v1794_v49 = vpop.permute.xlu0 %772  ;;  %v1812_v47 = vpop.permute.xlu1 %1016 }
  0x9f   : > { %v777_v52 = vsub.f32 %v1772_v21, %v751_v43  ;;  %v778_v12 = vsub.f32 %v1772_v21, %v752_v1 }
  0xa0   : > { %v1035_v28 = vmul.f32 1.442695, %v1019_v44  ;;  %v1037_v17 = vmul.f32 1.442695, %v1020_v14  ;;  %v783_v50 = vsub.f32 %v1794_v49, %v757_v27  ;;  %v784_v24 = vsub.f32 %v1794_v49, %v758_v11 }
  0xa1   : > { %v793_v10 = vadd.f32 %v777_v52, %v1762_v23  ;;  %v794_v19 = vadd.f32 %v778_v12, %v1768_v5 }
  0xa2   : > { %1371 = vpow2.f32 %v1035_v28  ;;  %v799_v4 = vadd.f32 %v783_v50, %v1742_v18  ;;  %v800_v8 = vadd.f32 %v784_v24, %v1752_v31  ;;  %v1818_v18 = vmul.f32 %v1362_v15, %v1700_v40 }
  0xa3   : > { %v809_v42 = vmax.f32 %v793_v10, 0.0  ;;  %v810_v45 = vmax.f32 %v794_v19, 0.0  ;;  %1373 = vpow2.f32 %v1037_v17  ;;  %v994_v50 = vmul.f32 %v1800_v25, %v1694_v7 }
  0xa4   : > { %v525_v62 = vpop.f32.mrf.mxu2  ;;  %v548_v53 = vpop.f32.mrf.mxu3  ;;  %v815_v34 = vmax.f32 %v799_v4, 0.0  ;;  %v816_v39 = vmax.f32 %v800_v8, 0.0  ;;  %1375 = vrcp.f32 %v982_v16  ;;  %v1843_v7 = vmul.f32 %v1810_v6, %v1716_v57 }
  0xa5   : > { %v1021_v31 = vmul.f32 %v1776_v35, %v809_v42  ;;  %v759_v55 = vmul.f32 2.0, %v525_v62  ;;  %v760_v32 = vmul.f32 2.0, %v548_v53  ;;  %v568_v33 = vpop.f32.mrf.mxu0  ;;  %v591_v58 = vpop.f32.mrf.mxu1  ;;  %v1022_v43 = vmul.f32 %v1776_v35, %v810_v45 }
  0xa6   : > { %v753_v30 = vmul.f32 2.0, %v568_v33  ;;  %v754_v1 = vmul.f32 2.0, %v591_v58  ;;  %v1027_v59 = vmul.f32 %v1812_v47, %v815_v34  ;;  %v1028_v0 = vmul.f32 %v1812_v47, %v816_v39 }
  0xa7   : > { %v785_v40 = vsub.f32 %v1794_v49, %v759_v55  ;;  %v786_v61 = vsub.f32 %v1794_v49, %v760_v32  ;;  %v1039_v27 = vmul.f32 1.442695, %v1021_v31  ;;  %v1041_v11 = vmul.f32 1.442695, %v1022_v43 }
  0xa8   : > { %v1372_v44 = vpop.eup %1371  ;;  %v779_v14 = vsub.f32 %v1772_v21, %v753_v30  ;;  %v780_v15 = vsub.f32 %v1772_v21, %v754_v1  ;;  %v1051_v52 = vmul.f32 1.442695, %v1027_v59  ;;  %v1053_v12 = vmul.f32 1.442695, %v1028_v0 }
  0xa9   : > { %v1374_v16 = vpop.eup %1373  ;;  %v801_v28 = vadd.f32 %v785_v40, %v1762_v23  ;;  %v802_v17 = vadd.f32 %v786_v61, %v1768_v5  ;;  %1377 = vpow2.f32 %v1039_v27  ;;  %v1067_v4 = vmul.f32 %v1372_v44, %v1787_v36 }
  0xaa   : > { %v1836_v24 = vpop.eup %1375  ;;  %v795_v10 = vadd.f32 %v779_v14, %v1770_v13  ;;  %v796_v19 = vadd.f32 %v780_v15, %v1778_v41  ;;  %1379 = vpow2.f32 %v1051_v52  ;;  %v1068_v45 = vmul.f32 %v1374_v16, %v992_v56 }
  0xab   : > { %v817_v8 = vmax.f32 %v801_v28, 0.0  ;;  %v818_v42 = vmax.f32 %v802_v17, 0.0  ;;  %1381 = vpow2.f32 %v1053_v12 }
  0xac   : > { %v811_v23 = vmax.f32 %v795_v10, 0.0  ;;  %v812_v62 = vmax.f32 %v796_v19, 0.0  ;;  %v614_v5 = vpop.f32.mrf.mxu2  ;;  %v637_v53 = vpop.f32.mrf.mxu3  ;;  %1383 = vpow2.f32 %v1041_v11  ;;  %v1083_v17 = vadd.f32 %v1068_v45, %v1067_v4 }
  0xad   : > { %v1029_v34 = vmul.f32 %v1812_v47, %v817_v8  ;;  %v1030_v39 = vmul.f32 %v1812_v47, %v818_v42  ;;  %v755_v31 = vmul.f32 2.0, %v614_v5  ;;  %v756_v55 = vmul.f32 2.0, %v637_v53  ;;  %v571_v36 = vpop.f32.mrf.mxu0  ;;  %v594_v32 = vpop.f32.mrf.mxu1 }
  0xae   : > { %v1023_v33 = vmul.f32 %v1776_v35, %v811_v23  ;;  %v1024_v56 = vmul.f32 %v1776_v35, %v812_v62  ;;  %v761_v58 = vmul.f32 2.0, %v571_v36  ;;  %v762_v43 = vmul.f32 2.0, %v594_v32 }
  0xaf   : > { %v1378_v30 = vpop.eup %1377  ;;  %v1055_v1 = vmul.f32 1.442695, %v1029_v34  ;;  %v1057_v59 = vmul.f32 1.442695, %v1030_v39  ;;  %v781_v57 = vsub.f32 %v1772_v21, %v755_v31  ;;  %v782_v0 = vsub.f32 %v1772_v21, %v756_v55 }
  0xb0   : > { %v1380_v40 = vpop.eup %1379  ;;  %v1043_v61 = vmul.f32 1.442695, %v1023_v33  ;;  %v1045_v27 = vmul.f32 1.442695, %v1024_v56  ;;  %v787_v11 = vsub.f32 %v1794_v49, %v761_v58  ;;  %v788_v44 = vsub.f32 %v1794_v49, %v762_v43 }
  0xb1   : > { %v1382_v14 = vpop.eup %1381  ;;  %1385 = vpow2.f32 %v1055_v1  ;;  %v797_v15 = vadd.f32 %v781_v57, %v1782_v54  ;;  %v798_v52 = vadd.f32 %v782_v0, %v1784_v48  ;;  %v1069_v12 = vmul.f32 %v1378_v30, %v1808_v3 }
  0xb2   : > { %v1384_v16 = vpop.eup %1383  ;;  %1387 = vpow2.f32 %v1043_v61  ;;  %v803_v28 = vadd.f32 %v787_v11, %v1770_v13  ;;  %v804_v21 = vadd.f32 %v788_v44, %v1778_v41  ;;  %v996_v4 = vmul.f32 %v1820_v20, %v1724_v60 }
  0xb3   : > { %1389 = vpow2.f32 %v1045_v27  ;;  %v813_v10 = vmax.f32 %v797_v15, 0.0  ;;  %v814_v19 = vmax.f32 %v798_v52, 0.0  ;;  %v1070_v8 = vmul.f32 %v1384_v16, %v994_v50 }
  0xb4   : > { %1391 = vpow2.f32 %v1057_v59  ;;  %v819_v42 = vmax.f32 %v803_v28, 0.0  ;;  %v820_v23 = vmax.f32 %v804_v21, 0.0  ;;  %v617_v62 = vpop.f32.mrf.mxu2  ;;  %v640_v5 = vpop.f32.mrf.mxu3  ;;  %v1085_v53 = vadd.f32 %v1083_v17, %v1069_v12 }
  0xb5   : > { %v1025_v34 = vmul.f32 %v1776_v35, %v813_v10  ;;  %v1026_v3 = vmul.f32 %v1776_v35, %v814_v19  ;;  %v763_v39 = vmul.f32 2.0, %v617_v62  ;;  %v764_v31 = vmul.f32 2.0, %v640_v5 }
  0xb6   : > { %v1031_v13 = vmul.f32 %v1812_v47, %v819_v42  ;;  %v1032_v41 = vmul.f32 %v1812_v47, %v820_v23  ;;  %v1087_v50 = vadd.f32 %v1085_v53, %v1070_v8  ;;  %v1002_v43 = vmul.f32 %v1800_v25, %v1707_v51 }
  0xb7   : > { %v1386_v45 = vpop.eup %1385  ;;  %v1047_v55 = vmul.f32 1.442695, %v1025_v34  ;;  %v1049_v36 = vmul.f32 1.442695, %v1026_v3  ;;  %v789_v32 = vsub.f32 %v1794_v49, %v763_v39  ;;  %v790_v33 = vsub.f32 %v1794_v49, %v764_v31  ;;  %v1112_v39 = vld [vmem:[%s380_s21] sm:$0xff] }
  0xb8   : > { %v1388_v56 = vpop.eup %1387  ;;  %v1059_v58 = vmul.f32 1.442695, %v1031_v13  ;;  %v1061_v35 = vmul.f32 1.442695, %v1032_v41  ;;  %v1075_v30 = vmul.f32 %v1380_v40, %v1790_v26  ;;  %v1076_v49 = vmul.f32 %v1382_v14, %v1815_v38 }
  0xb9   : > { %v1390_v1 = vpop.eup %1389  ;;  %1393 = vpow2.f32 %v1047_v55  ;;  %v805_v60 = vadd.f32 %v789_v32, %v1782_v54  ;;  %v806_v59 = vadd.f32 %v790_v33, %v1784_v48  ;;  %v1071_v57 = vmul.f32 %v1388_v56, %v1843_v7 }
  0xba   : > { %v1392_v0 = vpop.eup %1391  ;;  %1395 = vpow2.f32 %v1049_v36  ;;  %v1072_v61 = vmul.f32 %v1390_v1, %v996_v4  ;;  %v1077_v27 = vmul.f32 %v1386_v45, %v1818_v18  ;;  %v997_v26 = vmul.f32 %v1826_v9, %v1745_v22 }
  0xbb   : > { %1397 = vpow2.f32 %v1059_v58  ;;  %v821_v11 = vmax.f32 %v805_v60, 0.0  ;;  %v822_v51 = vmax.f32 %v806_v59, 0.0  ;;  %v1089_v25 = vadd.f32 %v1087_v50, %v1071_v57 }
  0xbc   : > { %1399 = vpow2.f32 %v1061_v35  ;;  %v1078_v54 = vmul.f32 %v1392_v0, %v1002_v43  ;;  %v1084_v40 = vadd.f32 %v1076_v49, %v1075_v30  ;;  %v998_v44 = vmul.f32 %v1836_v24, %v1754_v37 }
  0xbd   : > { %v1033_v48 = vmul.f32 %v1812_v47, %v821_v11  ;;  %v1034_v7 = vmul.f32 %v1812_v47, %v822_v51  ;;  %v1091_v38 = vadd.f32 %v1089_v25, %v1072_v61  ;;  %v1003_v18 = vmul.f32 %v1810_v6, %v1728_v63 }
  0xbe   : > { %v1086_v14 = vadd.f32 %v1084_v40, %v1077_v27  ;;  %v1004_v22 = vmul.f32 %v1820_v20, %v1732_v2  ;;  %v1005_v6 = vmul.f32 %v1826_v9, %v1747_v29  ;;  %v1006_v2 = vmul.f32 %v1836_v24, %v1758_v46  ;;  %v1113_v9 = vld [vmem:[%s380_s21 + $0x8] sm:$0xff] }
  0xbf   : > { %v1394_v15 = vpop.eup %1393  ;;  %v1063_v52 = vmul.f32 1.442695, %v1033_v48  ;;  %v1065_v12 = vmul.f32 1.442695, %v1034_v7 }
  0xc0   : > { %v1396_v16 = vpop.eup %1395  ;;  %v1073_v28 = vmul.f32 %v1394_v15, %v997_v26  ;;  %v1088_v21 = vadd.f32 %v1086_v14, %v1078_v54 }
  0xc1   : > { %v1398_v17 = vpop.eup %1397  ;;  %1401 = vpow2.f32 %v1063_v52  ;;  %v1074_v47 = vmul.f32 %v1396_v16, %v998_v44 }
  0xc2   : > { %v1400_v10 = vpop.eup %1399  ;;  %1403 = vpow2.f32 %v1065_v12  ;;  %v1093_v37 = vadd.f32 %v1091_v38, %v1073_v28  ;;  %v1079_v19 = vmul.f32 %v1398_v17, %v1003_v18 }
  0xc3   : > { %v1080_v8 = vmul.f32 %v1400_v10, %v1004_v22 }
  0xc4   : > { %v1095_v63 = vadd.f32 %v1093_v37, %v1074_v47  ;;  %v1090_v42 = vadd.f32 %v1088_v21, %v1079_v19 }
  0xc6   : > { %1108 = vadd.xlane.f32.xlu2 %v1095_v63  ;;  %v1092_v20 = vadd.f32 %v1090_v42, %v1080_v8 }
  0xc7   : > { %v1402_v23 = vpop.eup %1401 }
  0xc8   : > { %v1404_v62 = vpop.eup %1403  ;;  %v1081_v5 = vmul.f32 %v1402_v23, %v1005_v6 }
  0xc9   : > { %v1082_v53 = vmul.f32 %v1404_v62, %v1006_v2 }
  0xca   : > { %v1094_v34 = vadd.f32 %v1092_v20, %v1081_v5 }
  0xcc   : > { %v1096_v3 = vadd.f32 %v1094_v34, %v1082_v53 }
  0xce   : > { %1110 = vadd.xlane.f32.xlu2 %v1096_v3 }
 0x139   : > { %v1109_v29 = vpop.xlane.xlu2 %1108 }
 0x13a   : > { %v1114_v46 = vmul.f32 %v1112_v39, %v1109_v29 }
 0x13c   : > { %1117 = vst.msk [vmem:[%s395_s27] sm:$0xff] %vm1116_vm1, %v1114_v46 }
 0x141   : > { %v1111_v24 = vpop.xlane.xlu2 %1110 }
 0x142   : > { %v1115_v31 = vmul.f32 %v1113_v9, %v1111_v24 }
 0x144   : > { %1118 = vst.msk [vmem:[%s395_s27 + $0x8] sm:$0xff] %vm1116_vm1, %v1115_v31 }
 0x145 PF: > { %s16_s23 = sadd.s32 1, %s1427_s23   ;;  %s1912_s21 = smov %s1423_s22 }
 0x146   : > { %p13_p5 = scmp.ge.s32.totalorder %s16_s23, 4   ;;  %s1913_s22 = smov %s1915_s24 }
 0x148   :  { %15 = sbr.rel (!%p13_p5) target bundleno = 2 (0x2), region = 97 }

</bundles_post_ra>
